<compile_context>
chip_gen: v7x
topology: tpu7x:2x2x1
jax: 0.10.0
libtpu: 0.0.40
codegen_flags: <defaults>
</compile_context>

<pallas_src>
import math
import jax
import jax.numpy as jnp
from jax import lax
from jax.experimental import pallas as pl
from jax.experimental.pallas import tpu as pltpu

B, S, D = 2, 8, 32          # batch, seq, d_model
H = 4                       # attention heads
DK = D // H                 # head dim
D_FF = 64                   # feed-forward hidden dim
EPS = 1e-6                  # LayerNorm eps (added to std, like the reference)

SEG = 128                   # lane-aligned segment width in the packed slabs
BS = B * S                  # rows of the folded (batch*seq, d_model) slab
HBS = H * BS                # rows of the head-stacked attention slab
NEG = -1e30                 # additive mask for cross-batch score pairs


def _layernorm(z, a, b):
    # Reference LayerNorm: mean / unbiased std (ddof=1), divides by (std + eps).
    mean = jnp.mean(z, axis=-1, keepdims=True)
    var = jnp.sum((z - mean) ** 2, axis=-1, keepdims=True) * (1.0 / (D - 1))
    inv = pl.reciprocal(jnp.sqrt(var) + EPS)      # exact reciprocal (correctness)
    return a * (z - mean) * inv + b


def decoder_layer_kernel(x_ref, wslab_ref, w2t_ref, bslab_ref, lnb2_ref,
                         hmask_ref, bbias_ref, o_ref):
    f32, bf16 = jnp.float32, jnp.bfloat16
    x = x_ref[...].astype(f32)                           # (BS, D)
    hmask = hmask_ref[...]                               # (HBS, D) per-head lane mask

    ln1a, ln1b = lnb2_ref[0:1, :], lnb2_ref[1:2, :]
    ln2a, ln2b = lnb2_ref[2:3, :], lnb2_ref[3:4, :]
    b2 = lnb2_ref[4:5, :]

    # ---- sublayer 0: x + self_attn(LN(x), LN(x), LN(x)) (dropout = identity) ----
    y = _layernorm(x, ln1a, ln1b).astype(bf16)
    # Fused q/k/v projection: one (BS, D) @ (D, 128) MXU pass (pad cols are 0).
    qkv = jnp.dot(y, wslab_ref[:, 0:SEG],
                  preferred_element_type=f32) + bslab_ref[:, 0:SEG]
    q = qkv[:, 0 * D:1 * D]        # pre-scaled by 1/sqrt(DK) via the host packing
    k = qkv[:, 1 * D:2 * D]
    v = qkv[:, 2 * D:3 * D]

    # All B*H (S, S) score blocks in one MXU pass: replicate Q once per head on
    # the sublane axis, zero the other heads' lanes, contract all D lanes vs K.
    # Row r = h*BS + n of the stacked slab holds (head h, token n).
    q_big = (jnp.concatenate([q] * H, axis=0) * hmask).astype(bf16)      # (HBS, D)
    s = lax.dot_general(q_big, k.astype(bf16), (((1,), (1,)), ((), ())),
                        preferred_element_type=f32)                      # (HBS, BS)
    s = s + bbias_ref[...]                    # -1e30 on cross-batch token pairs
    # Single softmax chain for all B*H blocks.
    s = s - jnp.max(s, axis=-1, keepdims=True)
    p = jnp.exp(s)
    p = p * pl.reciprocal(jnp.sum(p, axis=-1, keepdims=True), approx=True)

    # P @ V for every head at once; keep each head's own lanes, then fold the H
    # sublane blocks back into the (BS, D) concatenated-head layout.
    r = jnp.dot(p.astype(bf16), v.astype(bf16),
                preferred_element_type=f32) * hmask                      # (HBS, D)
    heads = r[0:BS, :]
    for h in range(1, H):
        heads = heads + r[h * BS:(h + 1) * BS, :]                        # (BS, D)

    attn = jnp.dot(heads.astype(bf16), wslab_ref[:, SEG:SEG + D],
                   preferred_element_type=f32) + bslab_ref[:, SEG:SEG + D]
    x1 = x + attn

    # ---- sublayer 1: x1 + FFN(LN(x1)); FFN = relu(x W1^T + b1) W2^T + b2 ----
    y2 = _layernorm(x1, ln2a, ln2b).astype(bf16)
    h1 = jnp.dot(y2, wslab_ref[:, 2 * SEG:2 * SEG + D_FF],
                 preferred_element_type=f32) + bslab_ref[:, 2 * SEG:2 * SEG + D_FF]
    h1 = jnp.maximum(h1, 0.0).astype(bf16)
    ff = jnp.dot(h1, w2t_ref[...], preferred_element_type=f32) + b2
    o_ref[...] = (x1 + ff).astype(o_ref.dtype)


@jax.jit
def decoder_layer(x, params):
    f32, bf16 = jnp.float32, jnp.bfloat16
    scale = 1.0 / math.sqrt(DK)

    def pad_seg(m, used):
        return jnp.pad(m, ((0, 0), (0, SEG - used)))

    # One-time (XLA-side) packing: pre-transposed weights, 128-lane aligned
    # segments, bf16 weights, f32 biases, 1/sqrt(dk) folded into wq/bq.
    w_slab = jnp.concatenate([
        pad_seg(jnp.concatenate([params["wq"].T * scale, params["wk"].T,
                                 params["wv"].T], axis=1), 3 * D),
        pad_seg(params["wo"].T, D),
        pad_seg(params["w1"].T, D_FF),
    ], axis=1).astype(bf16)                                  # (D, 3*SEG) bf16
    b_slab = jnp.concatenate([
        pad_seg(jnp.concatenate([params["bq"] * scale, params["bk"],
                                 params["bv"]], axis=1), 3 * D),
        pad_seg(params["bo"], D),
        pad_seg(params["b1"], D_FF),
    ], axis=1).astype(f32)                                   # (1, 3*SEG) f32
    w2_t = params["w2"].T.astype(bf16)                       # (D_FF, D) bf16
    ln_b2 = jnp.concatenate([params["ln1a"], params["ln1b"],
                             params["ln2a"], params["ln2b"],
                             params["b2"]], axis=0)          # (5, D) f32

    # Static attention masks (constant-folded by XLA):
    #   head_mask[h*BS+n, d]  = 1 iff lane d belongs to head h
    #   batch_bias[h*BS+n, m] = 0 iff tokens n, m share a batch element, else -1e30
    head_mask = jnp.repeat(jnp.repeat(jnp.eye(H, dtype=f32), DK, axis=1),
                           BS, axis=0)                       # (HBS, D)
    tok = jnp.arange(BS) // S
    bb0 = jnp.where(tok[:, None] == tok[None, :], 0.0, NEG).astype(f32)
    batch_bias = jnp.concatenate([bb0] * H, axis=0)          # (HBS, BS)

    x2d = x.reshape(BS, D)                   # fold batch into the sublane axis
    vmem = pl.BlockSpec(memory_space=pltpu.MemorySpace.VMEM)
    out2d = pl.pallas_call(
        decoder_layer_kernel,
        out_shape=jax.ShapeDtypeStruct((BS, D), x.dtype),
        in_specs=[vmem] * 7,
        out_specs=vmem,
        input_output_aliases={0: 0},         # reuse x's HBM buffer for the output
    )(x2d, w_slab, w2_t, b_slab, ln_b2, head_mask, batch_bias)
    return out2d.reshape(B, S, D)


# ---------------- pure-JAX reference (mirrors the PyTorch forward) ----------------
def ref_forward(x, p):
    def ln(z, a, b):
        mean = z.mean(-1, keepdims=True)
        std = jnp.sqrt(((z - mean) ** 2).sum(-1, keepdims=True) / (z.shape[-1] - 1))
        return a * (z - mean) / (std + EPS) + b

    y = ln(x, p["ln1a"][0], p["ln1b"][0])
    q = y @ p["wq"].T + p["bq"][0]
    k = y @ p["wk"].T + p["bk"][0]
    v = y @ p["wv"].T + p["bv"][0]
    heads = []
    for h in range(H):
        sl = slice(h * DK, (h + 1) * DK)
        s = jnp.einsum("bqd,bkd->bqk", q[..., sl], k[..., sl]) / math.sqrt(DK)
        pmat = jax.nn.softmax(s, axis=-1)
        heads.append(jnp.einsum("bqk,bkd->bqd", pmat, v[..., sl]))
    attn = jnp.concatenate(heads, axis=-1) @ p["wo"].T + p["bo"][0]
    x1 = x + attn
    y2 = ln(x1, p["ln2a"][0], p["ln2b"][0])
    ff = jnp.maximum(y2 @ p["w1"].T + p["b1"][0], 0.0) @ p["w2"].T + p["b2"][0]
    return x1 + ff


def make_params(key):
    ks = jax.random.split(key, 12)
    n = lambda k, shape, s=0.05: (jax.random.normal(k, shape, jnp.float32) * s)
    return {
        "ln1a": jnp.ones((1, D), jnp.float32),
        "ln1b": jnp.zeros((1, D), jnp.float32),
        "wq": n(ks[0], (D, D)), "bq": n(ks[1], (1, D)),
        "wk": n(ks[2], (D, D)), "bk": n(ks[3], (1, D)),
        "wv": n(ks[4], (D, D)), "bv": n(ks[5], (1, D)),
        "wo": n(ks[6], (D, D)), "bo": n(ks[7], (1, D)),
        "ln2a": jnp.ones((1, D), jnp.float32),
        "ln2b": jnp.zeros((1, D), jnp.float32),
        "w1": n(ks[8], (D_FF, D)), "b1": n(ks[9], (1, D_FF)),
        "w2": n(ks[10], (D, D_FF)), "b2": n(ks[11], (1, D)),
    }


if __name__ == "__main__":
    key = jax.random.PRNGKey(0)
    kx, kp = jax.random.split(key)
    x = jax.random.normal(kx, (B, S, D), jnp.float32)
    params = make_params(kp)

    out = decoder_layer(x, params)
    out = jax.block_until_ready(out)

    ref = ref_forward(x, params)
    assert out.shape == (B, S, D)
    # Tolerance accounts for bf16 MXU operands (f32 accumulation) and the
    # approx-reciprocal softmax denominator.
    assert jnp.allclose(out, ref, rtol=1e-2, atol=5e-3), \
        f"max abs diff {jnp.max(jnp.abs(out - ref))}"
    print("KERNEL_OK")
</pallas_src>

<mosaic_0001>
module attributes {stable_mosaic.version = 11 : i64} {
  func.func @decoder_layer_kernel(%arg0: memref<16x32xf32, #tpu.memory_space<vmem>>, %arg1: memref<32x384xbf16, #tpu.memory_space<vmem>>, %arg2: memref<64x32xbf16, #tpu.memory_space<vmem>>, %arg3: memref<1x384xf32, #tpu.memory_space<vmem>>, %arg4: memref<5x32xf32, #tpu.memory_space<vmem>>, %arg5: memref<64x32xf32, #tpu.memory_space<vmem>>, %arg6: memref<64x16xf32, #tpu.memory_space<vmem>>, %arg7: memref<16x32xf32, #tpu.memory_space<vmem>>) attributes {dimension_semantics = [], scalar_prefetch = 0 : i64, scratch_operands = 0 : i64, tpu.core_type = #tpu.core_type<tc>} {
    %c0 = arith.constant 0 : index
    %c0_0 = arith.constant 0 : index
    %0 = vector.load %arg0[%c0, %c0_0] : memref<16x32xf32, #tpu.memory_space<vmem>>, vector<16x32xf32>
    %c0_1 = arith.constant 0 : index
    %c0_2 = arith.constant 0 : index
    %1 = vector.load %arg5[%c0_1, %c0_2] : memref<64x32xf32, #tpu.memory_space<vmem>>, vector<64x32xf32>
    %c0_3 = arith.constant 0 : index
    %c0_4 = arith.constant 0 : index
    %2 = vector.load %arg4[%c0_3, %c0_4] : memref<5x32xf32, #tpu.memory_space<vmem>>, vector<1x32xf32>
    %c1 = arith.constant 1 : index
    %c0_5 = arith.constant 0 : index
    %3 = vector.load %arg4[%c1, %c0_5] : memref<5x32xf32, #tpu.memory_space<vmem>>, vector<1x32xf32>
    %c2 = arith.constant 2 : index
    %c0_6 = arith.constant 0 : index
    %4 = vector.load %arg4[%c2, %c0_6] : memref<5x32xf32, #tpu.memory_space<vmem>>, vector<1x32xf32>
    %c3 = arith.constant 3 : index
    %c0_7 = arith.constant 0 : index
    %5 = vector.load %arg4[%c3, %c0_7] : memref<5x32xf32, #tpu.memory_space<vmem>>, vector<1x32xf32>
    %c4 = arith.constant 4 : index
    %c0_8 = arith.constant 0 : index
    %6 = vector.load %arg4[%c4, %c0_8] : memref<5x32xf32, #tpu.memory_space<vmem>>, vector<1x32xf32>
    %cst = arith.constant dense<0.000000e+00> : vector<16xf32>
    %7 = vector.multi_reduction <add>, %0, %cst [1] : vector<16x32xf32> to vector<16xf32>
    %8 = vector.shape_cast %7 : vector<16xf32> to vector<16x1xf32>
    %cst_9 = arith.constant 3.200000e+01 : f32
    %9 = vector.broadcast %cst_9 : f32 to vector<16x1xf32>
    %10 = arith.divf %8, %9 : vector<16x1xf32>
    %11 = vector.broadcast %10 : vector<16x1xf32> to vector<16x32xf32>
    %12 = arith.subf %0, %11 : vector<16x32xf32>
    %13 = arith.mulf %12, %12 : vector<16x32xf32>
    %cst_10 = arith.constant dense<0.000000e+00> : vector<16xf32>
    %14 = vector.multi_reduction <add>, %13, %cst_10 [1] : vector<16x32xf32> to vector<16xf32>
    %15 = vector.shape_cast %14 : vector<16xf32> to vector<16x1xf32>
    %cst_11 = arith.constant 0.0322580636 : f32
    %16 = vector.broadcast %cst_11 : f32 to vector<16x1xf32>
    %17 = arith.mulf %15, %16 : vector<16x1xf32>
    %18 = math.sqrt %17 : vector<16x1xf32>
    %cst_12 = arith.constant 9.99999997E-7 : f32
    %19 = vector.broadcast %cst_12 : f32 to vector<16x1xf32>
    %20 = arith.addf %18, %19 : vector<16x1xf32>
    %21 = tpu.reciprocal %20 : vector<16x1xf32> -> vector<16x1xf32>
    %22 = vector.broadcast %10 : vector<16x1xf32> to vector<16x32xf32>
    %23 = arith.subf %0, %22 : vector<16x32xf32>
    %24 = vector.broadcast %2 : vector<1x32xf32> to vector<16x32xf32>
    %25 = arith.mulf %24, %23 : vector<16x32xf32>
    %26 = vector.broadcast %21 : vector<16x1xf32> to vector<16x32xf32>
    %27 = arith.mulf %25, %26 : vector<16x32xf32>
    %28 = vector.broadcast %3 : vector<1x32xf32> to vector<16x32xf32>
    %29 = arith.addf %27, %28 : vector<16x32xf32>
    %30 = arith.truncf %29 : vector<16x32xf32> to vector<16x32xbf16>
    %c0_13 = arith.constant 0 : index
    %c0_14 = arith.constant 0 : index
    %31 = vector.load %arg1[%c0_13, %c0_14] : memref<32x384xbf16, #tpu.memory_space<vmem>>, vector<32x128xbf16>
    %cst_15 = arith.constant dense<0.000000e+00> : vector<16x128xf32>
    %32 = tpu.matmul %30, %31, %cst_15 {dimension_numbers = #tpu.dot_dimension_numbers<[1], [0], [0], [1], [0, 0, 1, 1], [], []>} : vector<16x32xbf16>, vector<32x128xbf16>, vector<16x128xf32> -> vector<16x128xf32>
    %c0_16 = arith.constant 0 : index
    %c0_17 = arith.constant 0 : index
    %33 = vector.load %arg3[%c0_16, %c0_17] : memref<1x384xf32, #tpu.memory_space<vmem>>, vector<1x128xf32>
    %34 = vector.broadcast %33 : vector<1x128xf32> to vector<16x128xf32>
    %35 = arith.addf %32, %34 : vector<16x128xf32>
    %36 = vector.extract_strided_slice %35 {offsets = [0, 0], sizes = [16, 32], strides = [1, 1]} : vector<16x128xf32> to vector<16x32xf32>
    %37 = vector.extract_strided_slice %35 {offsets = [0, 32], sizes = [16, 32], strides = [1, 1]} : vector<16x128xf32> to vector<16x32xf32>
    %38 = vector.extract_strided_slice %35 {offsets = [0, 64], sizes = [16, 32], strides = [1, 1]} : vector<16x128xf32> to vector<16x32xf32>
    %39 = tpu.concatenate %36, %36, %36, %36 in 0 : vector<16x32xf32>, vector<16x32xf32>, vector<16x32xf32>, vector<16x32xf32> -> vector<64x32xf32>
    %40 = arith.mulf %39, %1 : vector<64x32xf32>
    %41 = arith.truncf %40 : vector<64x32xf32> to vector<64x32xbf16>
    %42 = arith.truncf %37 : vector<16x32xf32> to vector<16x32xbf16>
    %cst_18 = arith.constant dense<0.000000e+00> : vector<64x16xf32>
    %43 = tpu.matmul %41, %42, %cst_18 {dimension_numbers = #tpu.dot_dimension_numbers<[1], [1], [0], [0], [0, 0, 1, 0], [], []>} : vector<64x32xbf16>, vector<16x32xbf16>, vector<64x16xf32> -> vector<64x16xf32>
    %c0_19 = arith.constant 0 : index
    %c0_20 = arith.constant 0 : index
    %44 = vector.load %arg6[%c0_19, %c0_20] : memref<64x16xf32, #tpu.memory_space<vmem>>, vector<64x16xf32>
    %45 = arith.addf %43, %44 : vector<64x16xf32>
    %cst_21 = arith.constant dense<0xFF800000> : vector<64xf32>
    %46 = vector.multi_reduction <maximumf>, %45, %cst_21 [1] : vector<64x16xf32> to vector<64xf32>
    %47 = vector.shape_cast %46 : vector<64xf32> to vector<64x1xf32>
    %48 = vector.broadcast %47 : vector<64x1xf32> to vector<64x16xf32>
    %49 = arith.subf %45, %48 : vector<64x16xf32>
    %50 = math.exp %49 : vector<64x16xf32>
    %cst_22 = arith.constant dense<0.000000e+00> : vector<64xf32>
    %51 = vector.multi_reduction <add>, %50, %cst_22 [1] : vector<64x16xf32> to vector<64xf32>
    %52 = vector.shape_cast %51 : vector<64xf32> to vector<64x1xf32>
    %53 = tpu.reciprocal %52 {approx = true} : vector<64x1xf32> -> vector<64x1xf32>
    %54 = vector.broadcast %53 : vector<64x1xf32> to vector<64x16xf32>
    %55 = arith.mulf %50, %54 : vector<64x16xf32>
    %56 = arith.truncf %55 : vector<64x16xf32> to vector<64x16xbf16>
    %57 = arith.truncf %38 : vector<16x32xf32> to vector<16x32xbf16>
    %cst_23 = arith.constant dense<0.000000e+00> : vector<64x32xf32>
    %58 = tpu.matmul %56, %57, %cst_23 {dimension_numbers = #tpu.dot_dimension_numbers<[1], [0], [0], [1], [0, 0, 1, 1], [], []>} : vector<64x16xbf16>, vector<16x32xbf16>, vector<64x32xf32> -> vector<64x32xf32>
    %59 = arith.mulf %58, %1 : vector<64x32xf32>
    %60 = vector.extract_strided_slice %59 {offsets = [0, 0], sizes = [16, 32], strides = [1, 1]} : vector<64x32xf32> to vector<16x32xf32>
    %61 = vector.extract_strided_slice %59 {offsets = [16, 0], sizes = [16, 32], strides = [1, 1]} : vector<64x32xf32> to vector<16x32xf32>
    %62 = arith.addf %60, %61 : vector<16x32xf32>
    %63 = vector.extract_strided_slice %59 {offsets = [32, 0], sizes = [16, 32], strides = [1, 1]} : vector<64x32xf32> to vector<16x32xf32>
    %64 = arith.addf %62, %63 : vector<16x32xf32>
    %65 = vector.extract_strided_slice %59 {offsets = [48, 0], sizes = [16, 32], strides = [1, 1]} : vector<64x32xf32> to vector<16x32xf32>
    %66 = arith.addf %64, %65 : vector<16x32xf32>
    %67 = arith.truncf %66 : vector<16x32xf32> to vector<16x32xbf16>
    %c0_24 = arith.constant 0 : index
    %c128 = arith.constant 128 : index
    %68 = vector.load %arg1[%c0_24, %c128] : memref<32x384xbf16, #tpu.memory_space<vmem>>, vector<32x32xbf16>
    %cst_25 = arith.constant dense<0.000000e+00> : vector<16x32xf32>
    %69 = tpu.matmul %67, %68, %cst_25 {dimension_numbers = #tpu.dot_dimension_numbers<[1], [0], [0], [1], [0, 0, 1, 1], [], []>} : vector<16x32xbf16>, vector<32x32xbf16>, vector<16x32xf32> -> vector<16x32xf32>
    %c0_26 = arith.constant 0 : index
    %c128_27 = arith.constant 128 : index
    %70 = vector.load %arg3[%c0_26, %c128_27] : memref<1x384xf32, #tpu.memory_space<vmem>>, vector<1x32xf32>
    %71 = vector.broadcast %70 : vector<1x32xf32> to vector<16x32xf32>
    %72 = arith.addf %69, %71 : vector<16x32xf32>
    %73 = arith.addf %0, %72 : vector<16x32xf32>
    %cst_28 = arith.constant dense<0.000000e+00> : vector<16xf32>
    %74 = vector.multi_reduction <add>, %73, %cst_28 [1] : vector<16x32xf32> to vector<16xf32>
    %75 = vector.shape_cast %74 : vector<16xf32> to vector<16x1xf32>
    %cst_29 = arith.constant 3.200000e+01 : f32
    %76 = vector.broadcast %cst_29 : f32 to vector<16x1xf32>
    %77 = arith.divf %75, %76 : vector<16x1xf32>
    %78 = vector.broadcast %77 : vector<16x1xf32> to vector<16x32xf32>
    %79 = arith.subf %73, %78 : vector<16x32xf32>
    %80 = arith.mulf %79, %79 : vector<16x32xf32>
    %cst_30 = arith.constant dense<0.000000e+00> : vector<16xf32>
    %81 = vector.multi_reduction <add>, %80, %cst_30 [1] : vector<16x32xf32> to vector<16xf32>
    %82 = vector.shape_cast %81 : vector<16xf32> to vector<16x1xf32>
    %cst_31 = arith.constant 0.0322580636 : f32
    %83 = vector.broadcast %cst_31 : f32 to vector<16x1xf32>
    %84 = arith.mulf %82, %83 : vector<16x1xf32>
    %85 = math.sqrt %84 : vector<16x1xf32>
    %cst_32 = arith.constant 9.99999997E-7 : f32
    %86 = vector.broadcast %cst_32 : f32 to vector<16x1xf32>
    %87 = arith.addf %85, %86 : vector<16x1xf32>
    %88 = tpu.reciprocal %87 : vector<16x1xf32> -> vector<16x1xf32>
    %89 = vector.broadcast %77 : vector<16x1xf32> to vector<16x32xf32>
    %90 = arith.subf %73, %89 : vector<16x32xf32>
    %91 = vector.broadcast %4 : vector<1x32xf32> to vector<16x32xf32>
    %92 = arith.mulf %91, %90 : vector<16x32xf32>
    %93 = vector.broadcast %88 : vector<16x1xf32> to vector<16x32xf32>
    %94 = arith.mulf %92, %93 : vector<16x32xf32>
    %95 = vector.broadcast %5 : vector<1x32xf32> to vector<16x32xf32>
    %96 = arith.addf %94, %95 : vector<16x32xf32>
    %97 = arith.truncf %96 : vector<16x32xf32> to vector<16x32xbf16>
    %c0_33 = arith.constant 0 : index
    %c256 = arith.constant 256 : index
    %98 = vector.load %arg1[%c0_33, %c256] : memref<32x384xbf16, #tpu.memory_space<vmem>>, vector<32x64xbf16>
    %cst_34 = arith.constant dense<0.000000e+00> : vector<16x64xf32>
    %99 = tpu.matmul %97, %98, %cst_34 {dimension_numbers = #tpu.dot_dimension_numbers<[1], [0], [0], [1], [0, 0, 1, 1], [], []>} : vector<16x32xbf16>, vector<32x64xbf16>, vector<16x64xf32> -> vector<16x64xf32>
    %c0_35 = arith.constant 0 : index
    %c256_36 = arith.constant 256 : index
    %100 = vector.load %arg3[%c0_35, %c256_36] : memref<1x384xf32, #tpu.memory_space<vmem>>, vector<1x64xf32>
    %101 = vector.broadcast %100 : vector<1x64xf32> to vector<16x64xf32>
    %102 = arith.addf %99, %101 : vector<16x64xf32>
    %cst_37 = arith.constant 0.000000e+00 : f32
    %103 = vector.broadcast %cst_37 : f32 to vector<16x64xf32>
    %104 = arith.maximumf %102, %103 : vector<16x64xf32>
    %105 = arith.truncf %104 : vector<16x64xf32> to vector<16x64xbf16>
    %c0_38 = arith.constant 0 : index
    %c0_39 = arith.constant 0 : index
    %106 = vector.load %arg2[%c0_38, %c0_39] : memref<64x32xbf16, #tpu.memory_space<vmem>>, vector<64x32xbf16>
    %cst_40 = arith.constant dense<0.000000e+00> : vector<16x32xf32>
    %107 = tpu.matmul %105, %106, %cst_40 {dimension_numbers = #tpu.dot_dimension_numbers<[1], [0], [0], [1], [0, 0, 1, 1], [], []>} : vector<16x64xbf16>, vector<64x32xbf16>, vector<16x32xf32> -> vector<16x32xf32>
    %108 = vector.broadcast %6 : vector<1x32xf32> to vector<16x32xf32>
    %109 = arith.addf %107, %108 : vector<16x32xf32>
    %110 = arith.addf %73, %109 : vector<16x32xf32>
    %c0_41 = arith.constant 0 : index
    %c0_42 = arith.constant 0 : index
    %111 = vector.load %arg7[%c0_41, %c0_42] : memref<16x32xf32, #tpu.memory_space<vmem>>, vector<16x32xf32>
    tpu.vector_store %arg7[%c0_41, %c0_42], %110 {strides = array<i32>} : memref<16x32xf32, #tpu.memory_space<vmem>>, vector<16x32xf32>,
    return
  }
}

</mosaic_0001>

<bundles_post_ra>
// kernel: decoder_layer.1
= control target key start
LH: loop header
LB: loop body
LE: loop exit
PB: predicated region body
PF: predicated region fallthrough
CT: control target
= control target key end

     0   :  { %vm42_vm0 = vcmask 261120   ;;  %v910_v14 = vmov 0.0   ;;  %vm911_vm1 = vmmov 0   ;;  %vm268_vm6 = vcmask 130048   ;;  %s1185_s0 = inlined_call_operand.vmem [shape: f32[16,32], index: 0, kind: input, shape index: {}, may-alias: {0,7}]   ;;  %s1186_s1 = inlined_call_operand.vmem [shape: bf16[32,384], index: 1, kind: input, shape index: {}]   ;;  %s1187_s4 = inlined_call_operand.vmem [shape: f32[5,32], index: 4, kind: input, shape index: {}]   ;;  %s1188_s3 = inlined_call_operand.vmem [shape: f32[1,384], index: 3, kind: input, shape index: {}]   ;;  %s1189_s5 = inlined_call_operand.vmem [shape: f32[64,32], index: 5, kind: input, shape index: {}]   ;;  %s1190_s6 = inlined_call_operand.vmem [shape: f32[64,16], index: 6, kind: input, shape index: {}]   ;;  %s1191_s2 = inlined_call_operand.vmem [shape: bf16[64,32], index: 2, kind: input, shape index: {}]   ;;  %s1192_s7 = inlined_call_operand.vmem [shape: f32[16,32], index: 7, kind: output, shape index: {}, may-alias: {0,7}]  }
   0x1   :  { %v957_v0 = vld [vmem:[%s1185_s0] sm:$0xff]  ;;  %v962_v1 = vld [vmem:[%s1185_s0 + $0x8] sm:$0xff]  ;;  %791 = vmatprep.subr.bf16.mxu0 %v910_v14  ;;  %795 = vmatprep.mubr.msk.bf16.mxu0 %vm911_vm1, %v910_v14  ;;  %v1000_v49 = vld [vmem:[%s1189_s5 + $0x10] sm:$0xff]  ;;  %vm684_vm11 = vcmask 523264  }
   0x2   :  { %v43_v2 = vsel %vm42_vm0, %v957_v0, 0.0  ;;  %v46_v3 = vsel %vm42_vm0, %v962_v1, 0.0  ;;  %v852_v15 = vld [vmem:[%s1186_s1] ss:$12 sps:$4 sm:$0xff]   ;;  %v853_v16 = vld [vmem:[%s1186_s1 + $0x18] ss:$12 sps:$4 sm:$0xff]  }
   0x3   :  { %44 = vadd.xlane.f32.xlu0 %v43_v2  ;;  %792 = vmatpush3.bf16.msra.mxu0 %v852_v15  ;;  %v737_v33 = vld [vmem:[%s1187_s4] ss:$0 sm:$0xff]  ;;  %v738_v39 = vld [vmem:[%s1187_s4 + $0x1] ss:$0 sm:$0xff]  ;;  %v1010_v52 = vld [vmem:[%s1189_s5 + $0x8] sm:$0xff] }
   0x4   :  { %793 = vmatprep.subr.bf16.mxu0 %v910_v14  ;;  %v739_v44 = vld [vmem:[%s1188_s3] ss:$0 sm:$0xff]  ;;  %v1015_v53 = vld [vmem:[%s1189_s5 + $0x18] sm:$0xff]  ;;  %v1020_v54 = vld [vmem:[%s1189_s5 + $0x28] sm:$0xff] }
   0x5   :  { %v995_v48 = vld [vmem:[%s1189_s5] sm:$0xff]  ;;  %v1025_v57 = vld [vmem:[%s1189_s5 + $0x30] sm:$0xff]  ;;  %v1030_v58 = vld [vmem:[%s1189_s5 + $0x38] sm:$0xff] }
   0x6   :  { %v1005_v50 = vld [vmem:[%s1189_s5 + $0x20] sm:$0xff]  ;;  %s912_s5 = smov 96  }
   0x7   :  { %47 = vadd.xlane.f32.xlu0 %v46_v3  ;;  %794 = vmatpush3.bf16.msra.mxu0 %v853_v16  ;;  %v177_v15 = vld [vmem:[%s1190_s6] sm:$0xff] }
  0x90   :  { %v45_v4 = vpop.xlane.xlu0 %44 }
  0x91   :  { %v50_v5 = vmul.f32 0.03125, %v45_v4 }
  0x93   :  { %v52_v6 = vsub.f32 %v957_v0, %v50_v5 }
  0x94   :  { %v48_v7 = vpop.xlane.xlu0 %47 }
  0x95   :  { %v51_v8 = vmul.f32 0.03125, %v48_v7  ;;  %v54_v9 = vmul.f32 %v52_v6, %v52_v6  ;;  %v86_v35 = vmul.f32 %v737_v33, %v52_v6 }
  0x97   :  { %v53_v10 = vsub.f32 %v962_v1, %v51_v8  ;;  %v56_v11 = vsel %vm42_vm0, %v54_v9, 0.0 }
  0x98   :  { %57 = vadd.xlane.f32.xlu1 %v56_v11 }
  0x99   :  { %v55_v12 = vmul.f32 %v53_v10, %v53_v10  ;;  %v87_v36 = vmul.f32 %v737_v33, %v53_v10 }
  0x9b   :  { %v59_v13 = vsel %vm42_vm0, %v55_v12, 0.0  ;;  %v179_v12 = vld [vmem:[%s1190_s6 + $0x10] sm:$0xff] }
  0x9c   :  { %60 = vadd.xlane.f32.xlu1 %v59_v13 }
 0x125   :  { %v58_v17 = vpop.xlane.xlu1 %57 }
 0x126   :  { %v62_v18 = vmul.f32 0.032258064, %v58_v17 }
 0x128   :  { %862 = vrsqrt.f32 %v62_v18  ;;  %vm66_vm2 = vcmp.eq.f32.partialorder %v62_v18, inf  ;;  %v69_v23 = vand.u32 2147483648, %v62_v18  ;;  %vm68_vm3 = vcmp.eq.f32.partialorder %v62_v18, 0.0 }
 0x129   :  { %v61_v19 = vpop.xlane.xlu1 %60 }
 0x12a   :  { %v63_v20 = vmul.f32 0.032258064, %v61_v19 }
 0x12c   :  { %864 = vrsqrt.f32 %v63_v20  ;;  %vm73_vm4 = vcmp.eq.f32.partialorder %v63_v20, inf  ;;  %v76_v29 = vand.u32 2147483648, %v63_v20  ;;  %vm75_vm5 = vcmp.eq.f32.partialorder %v63_v20, 0.0 }
 0x132   :  { %v863_v21 = vpop.eup %862 }
 0x133   :  { %v65_v22 = vmul.f32 %v863_v21, %v62_v18 }
 0x135   :  { %v67_v24 = vsel %vm66_vm2, %v62_v18, %v65_v22  ;;  %v180_v22 = vld [vmem:[%s1190_s6 + $0x18] sm:$0xff] }
 0x136   :  { %v865_v25 = vpop.eup %864  ;;  %v70_v26 = vsel %vm68_vm3, %v69_v23, %v67_v24  ;;  %v183_v23 = vld [vmem:[%s1190_s6 + $0x30] sm:$0xff] }
 0x137   :  { %v78_v27 = vadd.f32 1e-06, %v70_v26  ;;  %v72_v28 = vmul.f32 %v865_v25, %v63_v20  ;;  %v178_v26 = vld [vmem:[%s1190_s6 + $0x8] sm:$0xff] }
 0x139   :  { %866 = vrcp.f32 %v78_v27  ;;  %v74_v30 = vsel %vm73_vm4, %v63_v20, %v72_v28 }
 0x13a   :  { %v77_v31 = vsel %vm75_vm5, %v76_v29, %v74_v30 }
 0x13b   :  { %v79_v32 = vadd.f32 1e-06, %v77_v31 }
 0x13d   :  { %868 = vrcp.f32 %v79_v32 }
 0x143   :  { %v867_v34 = vpop.eup %866 }
 0x144   :  { %v88_v37 = vmul.f32 %v867_v34, %v86_v35  ;;  %v181_v35 = vld [vmem:[%s1190_s6 + $0x20] sm:$0xff] }
 0x146   :  { %v94_v41 = vadd.f32 %v738_v39, %v88_v37 }
 0x147   :  { %v869_v38 = vpop.eup %868 }
 0x148   :  { %v89_v40 = vmul.f32 %v869_v38, %v87_v36  ;;  %v182_v38 = vld [vmem:[%s1190_s6 + $0x28] sm:$0xff] }
 0x14a   :  { %v95_v42 = vadd.f32 %v738_v39, %v89_v40 }
 0x14c   :  { %v96_v43 = vpack.c.bf16 %v95_v42, %v94_v41  ;;  %v184_v41 = vld [vmem:[%s1190_s6 + $0x38] sm:$0xff]  ;;  %s913_s6 = smov 64  }
 0x14e   :  { %796 = vmatmul.mubr.msk.bf16.vlgmr.msra.gmra.mrb[0].mxu0 %vm42_vm0, %v96_v43 }
 0x221   :  { %v157_v45 = vpop.f32.mrb[0].mxu0 }
 0x222   :  { %v158_v46 = vadd.f32 %v739_v44, %v157_v45  ;;  %v797_v47 = vpop.f32.mrb[1].mxu0 }
 0x223   :  { %v160_v51 = vpop.f32.mrb[2].mxu0 }
 0x224   :  { %v161_v55 = vadd.f32 %v739_v44, %v160_v51  ;;  %v798_v56 = vpop.f32.mrb[3].mxu0  ;;  %v164_v59 = vmul.f32 %v158_v46, %v995_v48  ;;  %v166_v60 = vmul.f32 %v158_v46, %v1000_v49  ;;  %v168_v61 = vmul.f32 %v158_v46, %v1005_v50 }
 0x225   :  { %v170_v4 = vmul.f32 %v158_v46, %v1025_v57 }
 0x226   :  { %v1035_v62 = vpack.c.bf16 %v161_v55, %v158_v46  ;;  %v165_v63 = vmul.f32 %v161_v55, %v1010_v52  ;;  %v167_v2 = vmul.f32 %v161_v55, %v1015_v53  ;;  %v169_v3 = vmul.f32 %v161_v55, %v1020_v54 }
 0x227   :  { %v171_v5 = vmul.f32 %v161_v55, %v1030_v58 }
 0x228   :  { %186 = vrot.lane.b32.xlu0 %v1035_v62, %s912_s5  ;;  %v172_v6 = vpack.c.bf16 %v165_v63, %v164_v59  ;;  %v173_v7 = vpack.c.bf16 %v167_v2, %v166_v60  ;;  %v174_v8 = vpack.c.bf16 %v169_v3, %v168_v61 }
 0x229   :  { %v175_v9 = vpack.c.bf16 %v171_v5, %v170_v4 }
 0x22a   :  { %801 = vmatprep.mubr.msk.bf16.mxu1 %vm42_vm0, %v172_v6 }
 0x29a   :  { %v187_v10 = vpop.permute.xlu0 %186 }
 0x29b   :  { %847 = vmatprep.subr.msk.bf16.mxu1 %vm42_vm0, %v187_v10  ;;  %v201_v11 = vsel %vm42_vm0, %v187_v10, 0 }
 0x29c   :  { %800 = vmatpush3.bf16.xpose.msra.mxu1 %v201_v11 }
 0x29d   :  { %819 = vmatprep.subr.bf16.mxu1 %v910_v14 }
 0x2a3   :  { %802 = vmatmul.mubr.msk.bf16.vlgmr.msra.gmra.mrb[0].mxu1 %vm42_vm0, %v173_v7 }
 0x2a4   :  { %805 = vmatprep.mubr.msk.bf16.mxu1 %vm42_vm0, %v174_v8 }
 0x2ab   :  { %806 = vmatmul.mubr.msk.bf16.gmra.mrb[4].mxu1 %vm42_vm0, %v175_v9 }
 0x2ac   :  { %823 = vmatprep.mubr.msk.bf16.mxu1 %vm911_vm1, %v910_v14 }
 0x376   :  { %v803_v13 = vpop.f32.mrb[0].mxu1 }
 0x377   :  { %v246_v16 = vadd.f32 %v803_v13, %v179_v12  ;;  %v237_v17 = vpop.f32.mrb[1].mxu1 }
 0x378   :  { %v804_v18 = vpop.f32.mrb[2].mxu1  ;;  %v238_v19 = vadd.f32 %v237_v17, %v177_v15 }
 0x379   :  { %v240_v20 = vpop.f32.mrb[3].mxu1  ;;  %v275_v21 = vsel %vm268_vm6, %v246_v16, -inf  ;;  %v249_v24 = vadd.f32 %v804_v18, %v180_v22 }
 0x37a   :  { %276 = vmax.xlane.f32.xlu1 %v275_v21  ;;  %v269_v25 = vsel %vm268_vm6, %v238_v19, -inf  ;;  %v241_v31 = vadd.f32 %v240_v20, %v178_v26 }
 0x37b   :  { %v278_v34 = vsel %vm268_vm6, %v249_v24, -inf }
 0x37c   :  { %v272_v37 = vsel %vm268_vm6, %v241_v31, -inf }
 0x37e   :  { %v807_v27 = vpop.f32.mrb[4].mxu1  ;;  %270 = vmax.xlane.f32.xlu1 %v269_v25 }
 0x37f   :  { %v262_v28 = vadd.f32 %v807_v27, %v183_v23  ;;  %v253_v29 = vpop.f32.mrb[5].mxu1 }
 0x380   :  { %v808_v30 = vpop.f32.mrb[6].mxu1  ;;  %v254_v36 = vadd.f32 %v253_v29, %v181_v35 }
 0x381   :  { %v256_v32 = vpop.f32.mrb[7].mxu1  ;;  %v287_v33 = vsel %vm268_vm6, %v262_v28, -inf  ;;  %v265_v42 = vadd.f32 %v808_v30, %v184_v41 }
 0x382   :  { %288 = vmax.xlane.f32.xlu0 %v287_v33  ;;  %279 = vmax.xlane.f32.xlu1 %v278_v34  ;;  %v257_v39 = vadd.f32 %v256_v32, %v182_v38  ;;  %v281_v40 = vsel %vm268_vm6, %v254_v36, -inf }
 0x383   :  { %v290_v44 = vsel %vm268_vm6, %v265_v42, -inf }
 0x384   :  { %v284_v43 = vsel %vm268_vm6, %v257_v39, -inf }
 0x386   :  { %273 = vmax.xlane.f32.xlu1 %v272_v37 }
 0x38a   :  { %282 = vmax.xlane.f32.xlu1 %v281_v40 }
 0x38e   :  { %285 = vmax.xlane.f32.xlu1 %v284_v43 }
 0x392   :  { %291 = vmax.xlane.f32.xlu1 %v290_v44 }
 0x407   :  { %v277_v45 = vpop.xlane.xlu1 %276 }
 0x408   :  { %v295_v46 = vsub.f32 %v246_v16, %v277_v45 }
 0x40a   :  { %v305_v47 = vmul.f32 1.442695, %v295_v46 }
 0x40b   :  { %v271_v51 = vpop.xlane.xlu1 %270 }
 0x40c   :  { %870 = vpow2.f32 %v305_v47  ;;  %v293_v55 = vsub.f32 %v238_v19, %v271_v51 }
 0x40e   :  { %v301_v56 = vmul.f32 1.442695, %v293_v55 }
 0x40f   :  { %v280_v59 = vpop.xlane.xlu1 %279  ;;  %v289_v60 = vpop.xlane.xlu0 %288 }
 0x410   :  { %872 = vpow2.f32 %v301_v56  ;;  %v296_v61 = vsub.f32 %v249_v24, %v280_v59  ;;  %v299_v2 = vsub.f32 %v262_v28, %v289_v60 }
 0x412   :  { %v307_v63 = vmul.f32 1.442695, %v296_v61  ;;  %v313_v7 = vmul.f32 1.442695, %v299_v2 }
 0x413   :  { %v274_v3 = vpop.xlane.xlu1 %273 }
 0x414   :  { %v294_v4 = vsub.f32 %v241_v31, %v274_v3  ;;  %874 = vpow2.f32 %v307_v63 }
 0x416   :  { %v1084_v5 = vpop.eup %870  ;;  %v303_v6 = vmul.f32 1.442695, %v294_v4 }
 0x417   :  { %v283_v8 = vpop.xlane.xlu1 %282  ;;  %v323_v9 = vsel %vm268_vm6, %v1084_v5, 0.0 }
 0x418   :  { %876 = vpow2.f32 %v303_v6  ;;  %v297_v10 = vsub.f32 %v254_v36, %v283_v8  ;;  %324 = vadd.xlane.f32.xlu1 %v323_v9  ;;  %v855_v9 = vld [vmem:[%s1186_s1 + $0x1c] ss:$12 sps:$4 sm:$0xff]  }
 0x419   :  { %878 = vpow2.f32 %v313_v7 }
 0x41a   :  { %v873_v11 = vpop.eup %872  ;;  %v309_v12 = vmul.f32 1.442695, %v297_v10 }
 0x41b   :  { %v286_v13 = vpop.xlane.xlu1 %285  ;;  %v317_v15 = vsel %vm268_vm6, %v873_v11, 0.0 }
 0x41c   :  { %v298_v16 = vsub.f32 %v257_v39, %v286_v13  ;;  %318 = vadd.xlane.f32.xlu1 %v317_v15  ;;  %880 = vpow2.f32 %v309_v12 }
 0x41e   :  { %v875_v17 = vpop.eup %874  ;;  %v311_v18 = vmul.f32 1.442695, %v298_v16 }
 0x41f   :  { %v292_v19 = vpop.xlane.xlu1 %291  ;;  %v326_v21 = vsel %vm268_vm6, %v875_v17, 0.0 }
 0x420   :  { %v300_v20 = vsub.f32 %v265_v42, %v292_v19  ;;  %327 = vadd.xlane.f32.xlu1 %v326_v21  ;;  %882 = vpow2.f32 %v311_v18 }
 0x422   :  { %v877_v22 = vpop.eup %876  ;;  %v315_v23 = vmul.f32 1.442695, %v300_v20 }
 0x423   :  { %v320_v24 = vsel %vm268_vm6, %v877_v22, 0.0  ;;  %v879_v25 = vpop.eup %878 }
 0x424   :  { %884 = vpow2.f32 %v315_v23  ;;  %321 = vadd.xlane.f32.xlu1 %v320_v24  ;;  %v335_v26 = vsel %vm268_vm6, %v879_v25, 0.0 }
 0x426   :  { %v881_v27 = vpop.eup %880 }
 0x427   :  { %v329_v28 = vsel %vm268_vm6, %v881_v27, 0.0 }
 0x428   :  { %336 = vadd.xlane.f32.xlu1 %v335_v26 }
 0x42a   :  { %v883_v29 = vpop.eup %882 }
 0x42b   :  { %v332_v32 = vsel %vm268_vm6, %v883_v29, 0.0 }
 0x42c   :  { %330 = vadd.xlane.f32.xlu1 %v329_v28 }
 0x42e   :  { %v885_v30 = vpop.eup %884 }
 0x42f   :  { %v338_v31 = vsel %vm268_vm6, %v885_v30, 0.0 }
 0x430   :  { %339 = vadd.xlane.f32.xlu0 %v338_v31  ;;  %333 = vadd.xlane.f32.xlu1 %v332_v32 }
 0x441   :  { %361 = vrot.lane.b32.xlu1 %v1035_v62, %s913_s6 }
 0x4a5   :  { %v325_v33 = vpop.xlane.xlu1 %324 }
 0x4a9   :  { %v319_v34 = vpop.xlane.xlu1 %318 }
 0x4aa   :  { %886 = vrcp.f32 %v319_v34 }
 0x4ad   :  { %v328_v35 = vpop.xlane.xlu1 %327 }
 0x4b1   :  { %v322_v36 = vpop.xlane.xlu1 %321 }
 0x4b2   :  { %888 = vrcp.f32 %v322_v36 }
 0x4b3   :  { %890 = vrcp.f32 %v328_v35 }
 0x4b4   :  { %892 = vrcp.f32 %v325_v33  ;;  %v887_v39 = vpop.eup %886 }
 0x4b5   :  { %v337_v37 = vpop.xlane.xlu1 %336  ;;  %v349_v44 = vmul.f32 %v887_v39, %v873_v11 }
 0x4b6   :  { %894 = vrcp.f32 %v337_v37 }
 0x4b9   :  { %v331_v38 = vpop.xlane.xlu1 %330 }
 0x4ba   :  { %896 = vrcp.f32 %v331_v38 }
 0x4bc   :  { %v889_v40 = vpop.eup %888 }
 0x4bd   :  { %v340_v41 = vpop.xlane.xlu0 %339  ;;  %v891_v42 = vpop.eup %890  ;;  %v350_v62 = vmul.f32 %v889_v40, %v877_v22 }
 0x4be   :  { %898 = vrcp.f32 %v340_v41  ;;  %v334_v43 = vpop.xlane.xlu1 %333  ;;  %v893_v45 = vpop.eup %892  ;;  %v352_v47 = vmul.f32 %v891_v42, %v875_v17 }
 0x4bf   :  { %900 = vrcp.f32 %v334_v43  ;;  %v357_v46 = vpack.c.bf16 %v350_v62, %v349_v44  ;;  %v351_v55 = vmul.f32 %v893_v45, %v1084_v5  ;;  %v854_v5 = vld [vmem:[%s1186_s1 + $0x4] ss:$12 sps:$4 sm:$0xff]   ;;  %v856_v62 = vld [vmem:[%s1186_s1 + $0x8] ss:$12 sps:$4 sm:$0xff]   ;;  %v857_v45 = vld [vmem:[%s1186_s1 + $0x20] ss:$12 sps:$4 sm:$0xff]  }
 0x4c0   :  { %v895_v59 = vpop.eup %894  ;;  %820 = vmatpush3.bf16.msra.mxu1 %v854_v5 }
 0x4c1   :  { %811 = vmatprep.mubr.msk.bf16.mxu0 %vm268_vm6, %v357_v46  ;;  %v358_v56 = vpack.c.bf16 %v352_v47, %v351_v55  ;;  %v355_v2 = vmul.f32 %v895_v59, %v879_v25  ;;  %821 = vmatprep.subr.bf16.mxu1 %v910_v14  ;;  %v858_v46 = vld [vmem:[%s1191_s2] sm:$0xff]   ;;  %v859_v47 = vld [vmem:[%s1191_s2 + $0x8] sm:$0xff]  }
 0x4c2   :  { %v362_v51 = vpop.permute.xlu1 %361 }
 0x4c3   :  { %809 = vmatprep.subr.bf16.mxu0 %v362_v51 }
 0x4c4   :  { %810 = vmatpush3.bf16.msra.mxu0 %v362_v51  ;;  %v897_v60 = vpop.eup %896  ;;  %822 = vmatpush3.bf16.msra.mxu1 %v855_v9 }
 0x4c5   :  { %827 = vmatprep.subr.bf16.mxu0 %v910_v14  ;;  %v353_v4 = vmul.f32 %v897_v60, %v881_v27  ;;  %835 = vmatprep.subr.bf16.mxu1 %v910_v14 }
 0x4c7   :  { %812 = vmatmul.mubr.msk.bf16.vlgmr.msra.gmra.mrb[4].mxu0 %vm268_vm6, %v358_v56 }
 0x4c8   :  { %v899_v61 = vpop.eup %898  ;;  %828 = vmatpush3.bf16.msra.mxu0 %v856_v62 }
 0x4c9   :  { %v901_v63 = vpop.eup %900  ;;  %v356_v3 = vmul.f32 %v899_v61, %v885_v30  ;;  %829 = vmatprep.subr.bf16.mxu0 %v910_v14 }
 0x4ca   :  { %v354_v6 = vmul.f32 %v901_v63, %v883_v29 }
 0x4cb   :  { %v360_v7 = vpack.c.bf16 %v356_v3, %v355_v2 }
 0x4cc   :  { %v359_v8 = vpack.c.bf16 %v354_v6, %v353_v4  ;;  %830 = vmatpush3.bf16.msra.mxu0 %v857_v45 }
 0x4ce   :  { %815 = vmatprep.mubr.msk.bf16.mxu0 %vm268_vm6, %v359_v8 }
 0x4cf   :  { %816 = vmatmul.mubr.msk.bf16.gmra.mrb[8].mxu0 %vm268_vm6, %v360_v7 }
 0x4d0   :  { %831 = vmatprep.mubr.msk.bf16.mxu0 %vm911_vm1, %v910_v14 }
 0x59a   :  { %v813_v10 = vpop.f32.mrb[4].mxu0 }
 0x59b   :  { %v443_v11 = vmul.f32 %v813_v10, %v1000_v49  ;;  %v410_v12 = vpop.f32.mrb[5].mxu0 }
 0x59c   :  { %v441_v13 = vmul.f32 %v410_v12, %v995_v48  ;;  %v814_v15 = vpop.f32.mrb[6].mxu0 }
 0x59d   :  { %v444_v16 = vmul.f32 %v814_v15, %v1015_v53  ;;  %v413_v17 = vpop.f32.mrb[7].mxu0 }
 0x59e   :  { %v449_v18 = vadd.f32 %v443_v11, %v441_v13  ;;  %v442_v19 = vmul.f32 %v413_v17, %v1010_v52  ;;  %v755_v11 = vld [vmem:[%s1187_s4 + $0x2] ss:$0 sm:$0xff] }
 0x5a0   :  { %v450_v20 = vadd.f32 %v444_v16, %v442_v19 }
 0x5a2   :  { %v817_v21 = vpop.f32.mrb[8].mxu0 }
 0x5a3   :  { %v426_v22 = vpop.f32.mrb[9].mxu0  ;;  %v447_v26 = vmul.f32 %v817_v21, %v1025_v57 }
 0x5a4   :  { %v445_v23 = vmul.f32 %v426_v22, %v1005_v50  ;;  %v818_v24 = vpop.f32.mrb[10].mxu0  ;;  %v751_v50 = vld [vmem:[%s1188_s3 + $0x1] ss:$0 sm:$0xff] }
 0x5a5   :  { %v429_v25 = vpop.f32.mrb[11].mxu0  ;;  %v448_v28 = vmul.f32 %v818_v24, %v1030_v58  ;;  %v861_v24 = vld [vmem:[%s1191_s2 + $0x18] sm:$0xff]  }
 0x5a6   :  { %v451_v49 = vadd.f32 %v449_v18, %v445_v23  ;;  %v446_v27 = vmul.f32 %v429_v25, %v1020_v54  ;;  %v756_v18 = vld [vmem:[%s1187_s4 + $0x3] ss:$0 sm:$0xff]  ;;  %v860_v23 = vld [vmem:[%s1191_s2 + $0x10] sm:$0xff]   ;;  %v757_v25 = vld [vmem:[%s1188_s3 + $0x2] ss:$0 sm:$0xff] }
 0x5a8   :  { %v453_v48 = vadd.f32 %v451_v49, %v447_v26  ;;  %v452_v53 = vadd.f32 %v450_v20, %v446_v27 }
 0x5aa   :  { %v454_v29 = vadd.f32 %v452_v53, %v448_v28 }
 0x5ac   :  { %v455_v30 = vpack.c.bf16 %v454_v29, %v453_v48 }
 0x5ae   :  { %824 = vmatmul.mubr.msk.bf16.vlgmr.msra.gmra.mrb[8].mxu1 %vm42_vm0, %v455_v30 }
 0x5af   :  { %843 = vmatprep.mubr.msk.bf16.mxu1 %vm911_vm1, %v910_v14  ;;  %836 = vmatpush3.bf16.msra.mxu1 %v858_v46 }
 0x5b0   :  { %837 = vmatprep.subr.bf16.mxu1 %v910_v14 }
 0x5b3   :  { %838 = vmatpush3.bf16.msra.mxu1 %v859_v47 }
 0x5b4   :  { %839 = vmatprep.subr.bf16.mxu1 %v910_v14 }
 0x5b7   :  { %840 = vmatpush3.bf16.msra.mxu1 %v860_v23 }
 0x5b8   :  { %841 = vmatprep.subr.bf16.mxu1 %v910_v14  ;;  %v761_v14 = vld [vmem:[%s1187_s4 + $0x4] ss:$0 sm:$0xff] }
 0x5bb   :  { %842 = vmatpush3.bf16.msra.mxu1 %v861_v24 }
 0x681   :  { %v516_v52 = vpop.f32.mrb[8].mxu1 }
 0x682   :  { %v517_v57 = vadd.f32 %v751_v50, %v516_v52  ;;  %v825_v31 = vpop.f32.mrb[9].mxu1 }
 0x683   :  { %v519_v32 = vpop.f32.mrb[10].mxu1 }
 0x684   :  { %v1127_v54 = vadd.f32 %v517_v57, %v957_v0  ;;  %v520_v58 = vadd.f32 %v751_v50, %v519_v32  ;;  %v826_v33 = vpop.f32.mrb[11].mxu1 }
 0x686   :  { %v1130_v34 = vadd.f32 %v520_v58, %v962_v1  ;;  %v525_v35 = vsel %vm42_vm0, %v1127_v54, 0.0 }
 0x687   :  { %526 = vadd.xlane.f32.xlu0 %v525_v35 }
 0x688   :  { %v528_v36 = vsel %vm42_vm0, %v1130_v34, 0.0 }
 0x68b   :  { %529 = vadd.xlane.f32.xlu0 %v528_v36 }
 0x714   :  { %v527_v37 = vpop.xlane.xlu0 %526 }
 0x715   :  { %v531_v38 = vmul.f32 0.03125, %v527_v37 }
 0x717   :  { %v533_v39 = vsub.f32 %v1127_v54, %v531_v38 }
 0x718   :  { %v530_v40 = vpop.xlane.xlu0 %529 }
 0x719   :  { %v532_v0 = vmul.f32 0.03125, %v530_v40  ;;  %v535_v41 = vmul.f32 %v533_v39, %v533_v39  ;;  %v567_v13 = vmul.f32 %v755_v11, %v533_v39 }
 0x71b   :  { %v534_v42 = vsub.f32 %v1130_v34, %v532_v0  ;;  %v537_v1 = vsel %vm42_vm0, %v535_v41, 0.0 }
 0x71c   :  { %538 = vadd.xlane.f32.xlu0 %v537_v1 }
 0x71d   :  { %v536_v43 = vmul.f32 %v534_v42, %v534_v42  ;;  %v568_v15 = vmul.f32 %v755_v11, %v534_v42 }
 0x71f   :  { %v540_v44 = vsel %vm42_vm0, %v536_v43, 0.0 }
 0x720   :  { %541 = vadd.xlane.f32.xlu0 %v540_v44 }
 0x7a9   :  { %v539_v51 = vpop.xlane.xlu0 %538 }
 0x7aa   :  { %v543_v55 = vmul.f32 0.032258064, %v539_v51 }
 0x7ac   :  { %902 = vrsqrt.f32 %v543_v55  ;;  %vm547_vm7 = vcmp.eq.f32.partialorder %v543_v55, inf  ;;  %v550_v63 = vand.u32 2147483648, %v543_v55  ;;  %vm549_vm8 = vcmp.eq.f32.partialorder %v543_v55, 0.0 }
 0x7ad   :  { %v542_v56 = vpop.xlane.xlu0 %541 }
 0x7ae   :  { %v544_v59 = vmul.f32 0.032258064, %v542_v56 }
 0x7b0   :  { %904 = vrsqrt.f32 %v544_v59  ;;  %vm554_vm9 = vcmp.eq.f32.partialorder %v544_v59, inf  ;;  %v557_v8 = vand.u32 2147483648, %v544_v59  ;;  %vm556_vm10 = vcmp.eq.f32.partialorder %v544_v59, 0.0 }
 0x7b6   :  { %v903_v60 = vpop.eup %902 }
 0x7b7   :  { %v546_v61 = vmul.f32 %v903_v60, %v543_v55 }
 0x7b9   :  { %v548_v2 = vsel %vm547_vm7, %v543_v55, %v546_v61 }
 0x7ba   :  { %v905_v3 = vpop.eup %904  ;;  %v551_v4 = vsel %vm549_vm8, %v550_v63, %v548_v2 }
 0x7bb   :  { %v559_v6 = vadd.f32 1e-06, %v551_v4  ;;  %v553_v7 = vmul.f32 %v905_v3, %v544_v59 }
 0x7bd   :  { %906 = vrcp.f32 %v559_v6  ;;  %v555_v5 = vsel %vm554_vm9, %v544_v59, %v553_v7 }
 0x7be   :  { %v558_v9 = vsel %vm556_vm10, %v557_v8, %v555_v5 }
 0x7bf   :  { %v560_v10 = vadd.f32 1e-06, %v558_v9 }
 0x7c1   :  { %908 = vrcp.f32 %v560_v10 }
 0x7c7   :  { %v907_v12 = vpop.eup %906 }
 0x7c8   :  { %v569_v16 = vmul.f32 %v907_v12, %v567_v13 }
 0x7ca   :  { %v575_v20 = vadd.f32 %v756_v18, %v569_v16 }
 0x7cb   :  { %v909_v17 = vpop.eup %908 }
 0x7cc   :  { %v570_v19 = vmul.f32 %v909_v17, %v568_v15 }
 0x7ce   :  { %v576_v21 = vadd.f32 %v756_v18, %v570_v19 }
 0x7d0   :  { %v577_v22 = vpack.c.bf16 %v576_v21, %v575_v20 }
 0x7d2   :  { %832 = vmatmul.mubr.msk.bf16.vlgmr.msra.gmra.mrb[12].mxu0 %vm42_vm0, %v577_v22 }
 0x8a5   :  { %v638_v26 = vpop.f32.mrb[12].mxu0 }
 0x8a6   :  { %v639_v49 = vadd.f32 %v757_v25, %v638_v26  ;;  %v833_v27 = vpop.f32.mrb[13].mxu0 }
 0x8a7   :  { %v641_v48 = vpop.f32.mrb[14].mxu0 }
 0x8a8   :  { %v642_v28 = vadd.f32 %v757_v25, %v641_v48  ;;  %v834_v53 = vpop.f32.mrb[15].mxu0  ;;  %v645_v29 = vmax.f32 %v639_v49, 0.0 }
 0x8aa   :  { %v646_v30 = vmax.f32 %v642_v28, 0.0 }
 0x8ac   :  { %v647_v50 = vpack.c.bf16 %v646_v30, %v645_v29 }
 0x8ae   :  { %844 = vmatmul.mubr.msk.bf16.vlgmr.msra.gmra.mrb[12].mxu1 %vm684_vm11, %v647_v50 }
 0x981   :  { %v722_v52 = vpop.f32.mrb[12].mxu1 }
 0x982   :  { %v723_v57 = vadd.f32 %v761_v14, %v722_v52  ;;  %v845_v31 = vpop.f32.mrb[13].mxu1 }
 0x983   :  { %v725_v32 = vpop.f32.mrb[14].mxu1 }
 0x984   :  { %v729_v58 = vadd.f32 %v723_v57, %v1127_v54  ;;  %v726_v33 = vadd.f32 %v761_v14, %v725_v32  ;;  %v846_v35 = vpop.f32.mrb[15].mxu1 }
 0x986   :  { %731 = vst.msk [vmem:[%s1192_s7] sm:$0xff] %vm42_vm0, %v729_v58  ;;  %v730_v36 = vadd.f32 %v726_v33, %v1130_v34 }
 0x988   :  { %732 = vst.msk [vmem:[%s1192_s7 + $0x8] sm:$0xff] %vm42_vm0, %v730_v36 }

</bundles_post_ra>
